<compile_context>
chip_gen: v7x
topology: tpu7x:2x2x1
jax: 0.10.0
libtpu: 0.0.40
codegen_flags: <defaults>
</compile_context>

<pallas_src>
import numpy as np
import jax
import jax.numpy as jnp
from jax.experimental import pallas as pl
from jax.experimental.pallas import tpu as pltpu

# ----------------------------- config ----------------------------------------
B = 2              # demo batch
C = 8              # in_channels == num_electrodes of the DGCNN
H = W = 16         # spatial
G = 4              # graph_feature_size -> DGCNN in_channels = G*G
F = G * G
HID = 32           # dgcnn hid_channels
FC1 = 64
NCLS = 2
EPS_BN = 1e-5
EPS_L = 1e-10

HW = H * W
CH = C * HID

# Samples per grid step.  TB=1 keeps every per-tile weight exactly [C, C];
# raise it (up to 8 with this output layout) to fill more MXU rows when the
# batch is large (v5e wants >=128 activation rows, v6e/v7x >=256).
TB = 1
TBC = TB * C
OUT_ROWS = 8       # sublane-padded logits rows per grid step (>= TB)
OUT_LANES = 128    # lane-padded logits width (>= NCLS) -> unmasked stores

SMALL_LANES = 128
WIDE_LANES = ((max(HW, CH) + 127) // 128) * 128

assert TB <= OUT_ROWS and 2 * TBC <= SMALL_LANES and FC1 <= SMALL_LANES
assert TBC % 8 == 0 and HW % 128 == 0


# --------------------------- slab layouts (static) ----------------------------
def _round8(n):
    return ((n + 7) // 8) * 8


def _make_layout(sections):
    offs, row = {}, 0
    for name, rows, cols in sections:
        offs[name] = (row, rows, cols)
        row += _round8(rows)          # 8-aligned section starts
    return offs, _round8(row)


SMALL_OFFS, SMALL_ROWS = _make_layout([
    ("wu",   TBC, TBC),        # kron(I_TB, unet_w)
    ("l",    TBC, TBC),        # kron(I_TB, normalize_A(A))
    ("wcat", TBC, 2 * TBC),    # [kron(I_TB, Wfa) | kron(I_TB, Wfb)]
    ("w01",  2 * F, HID),      # [gc_w0 ; gc_w1]  (fused K=2 Chebynet weight)
    ("ssel", OUT_ROWS, TBC),   # per-sample row-fold selector (zero padded)
    ("fc2t", OUT_LANES, FC1),  # fc2 weight, transposed + lane padded
    ("colb", TBC, 2),          # unet / fusion biases as per-row columns
    ("bnsc", 1, F),            # eval-mode BN scale
    ("bnsh", 1, F),            # eval-mode BN shift
    ("fc1b", 1, FC1),
    ("fc2b", 1, OUT_LANES),
])

WIDE_OFFS, WIDE_ROWS = _make_layout([
    ("poolT", F, HW),          # kron(ph, pw): AdaptiveAvgPool2d(G) + flatten(2)
    ("teye",  HID, CH),        # tiled identity for the matmul-based flatten
    ("maske", TBC, CH),        # block mask (c == row % C)
    ("fc1t",  FC1, CH),        # fc1 weight, transposed
])


# --------------------------- fused pallas kernel ------------------------------
def _dot_nt(a, b):
    """a[M, K] . b[N, K]^T -> [M, N] on the MXU with f32 accumulation."""
    return jax.lax.dot_general(a, b, (((1,), (1,)), ((), ())),
                               preferred_element_type=jnp.float32)


def _fused_forward_kernel(x_ref, wide_ref, small_ref, o_ref):
    f32 = jnp.float32

    def sm(name):
        r0, rows, cols = SMALL_OFFS[name]
        return small_ref[r0:r0 + rows, :cols]

    def wd(name):
        r0, rows, cols = WIDE_OFFS[name]
        return wide_ref[r0:r0 + rows, :cols]

    x = x_ref[...]                                               # [TBC, HW]
    colb = sm("colb")                                            # [TBC, 2]

    # --- self.unet stand-in: per-sample 1x1 conv + ReLU -----------------------
    # TODO(synk): UNET_INCEPTION definition was not provided in the source; a
    # shape-preserving 1x1-conv + ReLU stand-in is used for self.unet.
    xu = jnp.maximum(
        jnp.dot(sm("wu"), x, preferred_element_type=f32) + colb[:, 0:1], 0.0)

    # --- torch.cat((x, x_), 1) + channel_fusion 1x1 conv: ONE fused matmul ----
    xcat = jnp.concatenate([x, xu], axis=0)                      # [2*TBC, HW]
    fused = (jnp.dot(sm("wcat"), xcat, preferred_element_type=f32)
             + colb[:, 1:2])                                     # [TBC, HW]

    # --- AdaptiveAvgPool2d(G) + flatten(2): one NT matmul with kron(ph, pw) ---
    feats = _dot_nt(fused, wd("poolT"))                          # [TBC, F]

    # --- DGCNN.BN1: eval-mode BatchNorm folded into per-feature scale/shift ---
    xn = feats * sm("bnsc") + sm("bnsh")                         # [TBC, F]

    # --- Chebynet (K=2) fused: [x | Lx] @ [W0 ; W1], then ReLU ----------------
    lx = jnp.dot(sm("l"), xn, preferred_element_type=f32)        # [TBC, F]
    res = jnp.maximum(
        jnp.dot(jnp.concatenate([xn, lx], axis=1), sm("w01"),
                preferred_element_type=f32), 0.0)                # [TBC, HID]

    # --- reshape(TB, C*HID) + fc1, done with matmuls (exact, no relayout) -----
    res_wide = jnp.dot(res, wd("teye"), preferred_element_type=f32) * wd("maske")
    z = _dot_nt(res_wide, wd("fc1t"))                            # [TBC, FC1]
    h1 = jnp.maximum(
        jnp.dot(sm("ssel"), z, preferred_element_type=f32) + sm("fc1b"), 0.0)

    # --- fc2 with lane/sublane-padded weight -> one unmasked (8,128) store ----
    o_ref[...] = _dot_nt(h1, sm("fc2t")) + sm("fc2b")            # [OUT_ROWS, OUT_LANES]


# ----------------------------- parameters -------------------------------------
def _xavier_normal(key, shape, fan_in, fan_out):
    std = float(np.sqrt(2.0 / (fan_in + fan_out)))
    return std * jax.random.normal(key, shape, dtype=jnp.float32)


def init_params(key):
    ks = jax.random.split(key, 8)
    p = {}
    p["unet_w"] = _xavier_normal(ks[0], (C, C), C, C)            # [Cout, Cin]
    p["unet_b"] = jnp.zeros((C,), jnp.float32)
    # channel_fusion Conv2d(2C -> C, 1x1) weight split into the half acting on
    # x (wa == torch weight[:, :C]) and the half acting on unet(x) (wb).
    p["fuse_wa"] = _xavier_normal(ks[1], (C, C), 2 * C, C)
    p["fuse_wb"] = _xavier_normal(ks[2], (C, C), 2 * C, C)
    p["fuse_b"] = jnp.zeros((C,), jnp.float32)
    p["A"] = _xavier_normal(ks[3], (C, C), C, C)                 # learned adjacency
    p["bn_gamma"] = jnp.ones((F,), jnp.float32)
    p["bn_beta"] = jnp.zeros((F,), jnp.float32)
    p["bn_rmean"] = jnp.zeros((F,), jnp.float32)                 # eval-mode stats
    p["bn_rvar"] = jnp.ones((F,), jnp.float32)
    p["gc_w0"] = _xavier_normal(ks[4], (F, HID), F, HID)
    p["gc_w1"] = _xavier_normal(ks[5], (F, HID), F, HID)
    p["fc1_wt"] = _xavier_normal(ks[6], (CH, FC1), CH, FC1)
    p["fc1_b"] = jnp.zeros((FC1,), jnp.float32)
    p["fc2_wt"] = _xavier_normal(ks[7], (FC1, NCLS), FC1, NCLS)
    p["fc2_b"] = jnp.zeros((NCLS,), jnp.float32)
    return p


def _adaptive_pool_matrix(in_size, out_size):
    """Row-stochastic averaging matrix matching AdaptiveAvgPool bin edges."""
    m = np.zeros((out_size, in_size), np.float32)
    for i in range(out_size):
        s = (i * in_size) // out_size
        e = -((-(i + 1) * in_size) // out_size)                  # ceil division
        m[i, s:e] = 1.0 / (e - s)
    return m


# ------------------------- once-per-weight-update prep ------------------------
def _pack(pieces, offs, total_rows, lanes):
    slab = jnp.zeros((total_rows, lanes), jnp.float32)
    for name, (r0, rows, cols) in offs.items():
        piece = jnp.asarray(pieces[name], jnp.float32)
        assert piece.shape == (rows, cols), (name, piece.shape, (rows, cols))
        slab = slab.at[r0:r0 + rows, :cols].set(piece)
    return slab


def prepare(params):
    """Parameter-only preprocessing, hoisted out of forward(): normalize_A,
    per-tile block-diag kron, matmul fusions, eval-mode BN folding, weight
    transposes/padding and slab packing.  Run once per weight update."""
    eye_tb = jnp.eye(TB, dtype=jnp.float32)

    # normalize_A: L = D^{-1/2} relu(A) D^{-1/2}
    a = jnp.maximum(params["A"], 0.0)
    dinv = 1.0 / jnp.sqrt(jnp.sum(a, axis=1) + EPS_L)
    l_small = dinv[:, None] * a * dinv[None, :]

    # eval-mode BatchNorm1d folded to a single per-feature scale / shift
    bn_scale = params["bn_gamma"] * jax.lax.rsqrt(params["bn_rvar"] + EPS_BN)
    bn_shift = params["bn_beta"] - params["bn_rmean"] * bn_scale

    # data-independent constants (numpy, built once)
    pool_t = np.kron(_adaptive_pool_matrix(H, G), _adaptive_pool_matrix(W, G))
    teye = np.tile(np.eye(HID, dtype=np.float32), (1, C))
    r = np.arange(TBC)
    maske = (r[:, None] % C == np.arange(CH)[None, :] // HID).astype(np.float32)
    t = np.arange(OUT_ROWS)[:, None]
    ssel = ((t < TB) & (r[None, :] // C == t)).astype(np.float32)

    small = {
        "wu":   jnp.kron(eye_tb, params["unet_w"]),
        "l":    jnp.kron(eye_tb, l_small),
        "wcat": jnp.concatenate([jnp.kron(eye_tb, params["fuse_wa"]),
                                 jnp.kron(eye_tb, params["fuse_wb"])], axis=1),
        "w01":  jnp.concatenate([params["gc_w0"], params["gc_w1"]], axis=0),
        "ssel": ssel,
        "fc2t": jnp.zeros((OUT_LANES, FC1), jnp.float32)
                   .at[:NCLS].set(params["fc2_wt"].T),
        "colb": jnp.stack([jnp.tile(params["unet_b"], TB),
                           jnp.tile(params["fuse_b"], TB)], axis=1),
        "bnsc": bn_scale[None, :],
        "bnsh": bn_shift[None, :],
        "fc1b": params["fc1_b"][None, :],
        "fc2b": jnp.zeros((1, OUT_LANES), jnp.float32)
                   .at[0, :NCLS].set(params["fc2_b"]),
    }
    wide = {
        "poolT": pool_t,
        "teye":  teye,
        "maske": maske,
        "fc1t":  params["fc1_wt"].T,
    }
    return (_pack(wide, WIDE_OFFS, WIDE_ROWS, WIDE_LANES),
            _pack(small, SMALL_OFFS, SMALL_ROWS, SMALL_LANES))


# ------------------------------- forward --------------------------------------
@jax.jit
def forward(x, wide_slab, small_slab):
    # x: [B, C, H, W]  (NCHW, matching PyTorch)
    b, c, h, w = x.shape
    assert (c, h, w) == (C, H, W), (c, h, w)
    n_tiles = -(-b // TB)
    x2 = x.reshape(b * c, HW)
    pad_rows = n_tiles * TBC - b * c
    if pad_rows:
        x2 = jnp.pad(x2, ((0, pad_rows), (0, 0)))

    out = pl.pallas_call(
        _fused_forward_kernel,
        grid=(n_tiles,),
        in_specs=[
            pl.BlockSpec((TBC, HW), lambda i: (i, 0)),                 # per-step activations
            pl.BlockSpec((WIDE_ROWS, WIDE_LANES), lambda i: (0, 0)),   # VMEM-resident slab
            pl.BlockSpec((SMALL_ROWS, SMALL_LANES), lambda i: (0, 0)), # VMEM-resident slab
        ],
        out_specs=pl.BlockSpec((OUT_ROWS, OUT_LANES), lambda i: (i, 0)),
        out_shape=jax.ShapeDtypeStruct((n_tiles * OUT_ROWS, OUT_LANES), jnp.float32),
        compiler_params=pltpu.CompilerParams(
            dimension_semantics=("parallel",)),
    )(x2, wide_slab, small_slab)

    logits = out.reshape(n_tiles, OUT_ROWS, OUT_LANES)[:, :TB, :NCLS]
    return logits.reshape(n_tiles * TB, NCLS)[:b]


if __name__ == "__main__":
    key = jax.random.PRNGKey(0)
    pkey, xkey = jax.random.split(key)
    params = init_params(pkey)
    wide_slab, small_slab = prepare(params)       # hoisted: once per weight update
    x = jax.random.normal(xkey, (B, C, H, W), dtype=jnp.float32)
    out = forward(x, wide_slab, small_slab)
    out = jax.block_until_ready(out)
    assert out.shape == (B, NCLS), out.shape
    print("KERNEL_OK")
</pallas_src>

<mosaic_0001>
module attributes {stable_mosaic.version = 11 : i64} {
  func.func @_fused_forward_kernel(%arg0: i32, %arg1: memref<8x256xf32, #tpu.memory_space<vmem>>, %arg2: memref<120x256xf32, #tpu.memory_space<vmem>>, %arg3: memref<232x128xf32, #tpu.memory_space<vmem>>, %arg4: memref<8x128xf32, #tpu.memory_space<vmem>>) attributes {dimension_semantics = [#tpu.dimension_semantics<parallel>], iteration_bounds = array<i64: 2>, scalar_prefetch = 0 : i64, scratch_operands = 0 : i64, tpu.core_type = #tpu.core_type<tc>, window_params = [{transform_indices = @transform_0, window_bounds = array<i64: 8, 256>}, {pipeline_mode = #tpu.pipeline_mode<synchronous>, transform_indices = @transform_1, window_bounds = array<i64: 120, 256>}, {pipeline_mode = #tpu.pipeline_mode<synchronous>, transform_indices = @transform_2, window_bounds = array<i64: 232, 128>}, {transform_indices = @transform_3, window_bounds = array<i64: 8, 128>}]} {
    %c0 = arith.constant 0 : index
    %c0_0 = arith.constant 0 : index
    %0 = vector.load %arg1[%c0, %c0_0] : memref<8x256xf32, #tpu.memory_space<vmem>>, vector<8x256xf32>
    %c192 = arith.constant 192 : index
    %c0_1 = arith.constant 0 : index
    %1 = vector.load %arg3[%c192, %c0_1] : memref<232x128xf32, #tpu.memory_space<vmem>>, vector<8x2xf32>
    %c0_2 = arith.constant 0 : index
    %c0_3 = arith.constant 0 : index
    %2 = vector.load %arg3[%c0_2, %c0_3] : memref<232x128xf32, #tpu.memory_space<vmem>>, vector<8x8xf32>
    %cst = arith.constant dense<0.000000e+00> : vector<8x256xf32>
    %3 = tpu.matmul %2, %0, %cst {dimension_numbers = #tpu.dot_dimension_numbers<[1], [0], [0], [1], [0, 0, 1, 1], [], []>} : vector<8x8xf32>, vector<8x256xf32>, vector<8x256xf32> -> vector<8x256xf32>
    %4 = vector.extract_strided_slice %1 {offsets = [0, 0], sizes = [8, 1], strides = [1, 1]} : vector<8x2xf32> to vector<8x1xf32>
    %5 = vector.broadcast %4 : vector<8x1xf32> to vector<8x256xf32>
    %6 = arith.addf %3, %5 : vector<8x256xf32>
    %cst_4 = arith.constant 0.000000e+00 : f32
    %7 = vector.broadcast %cst_4 : f32 to vector<8x256xf32>
    %8 = arith.maximumf %6, %7 : vector<8x256xf32>
    %9 = tpu.concatenate %0, %8 in 0 : vector<8x256xf32>, vector<8x256xf32> -> vector<16x256xf32>
    %c16 = arith.constant 16 : index
    %c0_5 = arith.constant 0 : index
    %10 = vector.load %arg3[%c16, %c0_5] : memref<232x128xf32, #tpu.memory_space<vmem>>, vector<8x16xf32>
    %cst_6 = arith.constant dense<0.000000e+00> : vector<8x256xf32>
    %11 = tpu.matmul %10, %9, %cst_6 {dimension_numbers = #tpu.dot_dimension_numbers<[1], [0], [0], [1], [0, 0, 1, 1], [], []>} : vector<8x16xf32>, vector<16x256xf32>, vector<8x256xf32> -> vector<8x256xf32>
    %12 = vector.extract_strided_slice %1 {offsets = [0, 1], sizes = [8, 1], strides = [1, 1]} : vector<8x2xf32> to vector<8x1xf32>
    %13 = vector.broadcast %12 : vector<8x1xf32> to vector<8x256xf32>
    %14 = arith.addf %11, %13 : vector<8x256xf32>
    %c0_7 = arith.constant 0 : index
    %c0_8 = arith.constant 0 : index
    %15 = vector.load %arg2[%c0_7, %c0_8] : memref<120x256xf32, #tpu.memory_space<vmem>>, vector<16x256xf32>
    %cst_9 = arith.constant dense<0.000000e+00> : vector<8x16xf32>
    %16 = tpu.matmul %14, %15, %cst_9 {dimension_numbers = #tpu.dot_dimension_numbers<[1], [1], [0], [0], [0, 0, 1, 0], [], []>} : vector<8x256xf32>, vector<16x256xf32>, vector<8x16xf32> -> vector<8x16xf32>
    %c200 = arith.constant 200 : index
    %c0_10 = arith.constant 0 : index
    %17 = vector.load %arg3[%c200, %c0_10] : memref<232x128xf32, #tpu.memory_space<vmem>>, vector<1x16xf32>
    %18 = vector.broadcast %17 : vector<1x16xf32> to vector<8x16xf32>
    %19 = arith.mulf %16, %18 : vector<8x16xf32>
    %c208 = arith.constant 208 : index
    %c0_11 = arith.constant 0 : index
    %20 = vector.load %arg3[%c208, %c0_11] : memref<232x128xf32, #tpu.memory_space<vmem>>, vector<1x16xf32>
    %21 = vector.broadcast %20 : vector<1x16xf32> to vector<8x16xf32>
    %22 = arith.addf %19, %21 : vector<8x16xf32>
    %c8 = arith.constant 8 : index
    %c0_12 = arith.constant 0 : index
    %23 = vector.load %arg3[%c8, %c0_12] : memref<232x128xf32, #tpu.memory_space<vmem>>, vector<8x8xf32>
    %cst_13 = arith.constant dense<0.000000e+00> : vector<8x16xf32>
    %24 = tpu.matmul %23, %22, %cst_13 {dimension_numbers = #tpu.dot_dimension_numbers<[1], [0], [0], [1], [0, 0, 1, 1], [], []>} : vector<8x8xf32>, vector<8x16xf32>, vector<8x16xf32> -> vector<8x16xf32>
    %25 = tpu.concatenate %22, %24 in 1 : vector<8x16xf32>, vector<8x16xf32> -> vector<8x32xf32>
    %c24 = arith.constant 24 : index
    %c0_14 = arith.constant 0 : index
    %26 = vector.load %arg3[%c24, %c0_14] : memref<232x128xf32, #tpu.memory_space<vmem>>, vector<32x32xf32>
    %cst_15 = arith.constant dense<0.000000e+00> : vector<8x32xf32>
    %27 = tpu.matmul %25, %26, %cst_15 {dimension_numbers = #tpu.dot_dimension_numbers<[1], [0], [0], [1], [0, 0, 1, 1], [], []>} : vector<8x32xf32>, vector<32x32xf32>, vector<8x32xf32> -> vector<8x32xf32>
    %cst_16 = arith.constant 0.000000e+00 : f32
    %28 = vector.broadcast %cst_16 : f32 to vector<8x32xf32>
    %29 = arith.maximumf %27, %28 : vector<8x32xf32>
    %c16_17 = arith.constant 16 : index
    %c0_18 = arith.constant 0 : index
    %30 = vector.load %arg2[%c16_17, %c0_18] : memref<120x256xf32, #tpu.memory_space<vmem>>, vector<32x256xf32>
    %cst_19 = arith.constant dense<0.000000e+00> : vector<8x256xf32>
    %31 = tpu.matmul %29, %30, %cst_19 {dimension_numbers = #tpu.dot_dimension_numbers<[1], [0], [0], [1], [0, 0, 1, 1], [], []>} : vector<8x32xf32>, vector<32x256xf32>, vector<8x256xf32> -> vector<8x256xf32>
    %c48 = arith.constant 48 : index
    %c0_20 = arith.constant 0 : index
    %32 = vector.load %arg2[%c48, %c0_20] : memref<120x256xf32, #tpu.memory_space<vmem>>, vector<8x256xf32>
    %33 = arith.mulf %31, %32 : vector<8x256xf32>
    %c56 = arith.constant 56 : index
    %c0_21 = arith.constant 0 : index
    %34 = vector.load %arg2[%c56, %c0_21] : memref<120x256xf32, #tpu.memory_space<vmem>>, vector<64x256xf32>
    %cst_22 = arith.constant dense<0.000000e+00> : vector<8x64xf32>
    %35 = tpu.matmul %33, %34, %cst_22 {dimension_numbers = #tpu.dot_dimension_numbers<[1], [1], [0], [0], [0, 0, 1, 0], [], []>} : vector<8x256xf32>, vector<64x256xf32>, vector<8x64xf32> -> vector<8x64xf32>
    %c56_23 = arith.constant 56 : index
    %c0_24 = arith.constant 0 : index
    %36 = vector.load %arg3[%c56_23, %c0_24] : memref<232x128xf32, #tpu.memory_space<vmem>>, vector<8x8xf32>
    %cst_25 = arith.constant dense<0.000000e+00> : vector<8x64xf32>
    %37 = tpu.matmul %36, %35, %cst_25 {dimension_numbers = #tpu.dot_dimension_numbers<[1], [0], [0], [1], [0, 0, 1, 1], [], []>} : vector<8x8xf32>, vector<8x64xf32>, vector<8x64xf32> -> vector<8x64xf32>
    %c216 = arith.constant 216 : index
    %c0_26 = arith.constant 0 : index
    %38 = vector.load %arg3[%c216, %c0_26] : memref<232x128xf32, #tpu.memory_space<vmem>>, vector<1x64xf32>
    %39 = vector.broadcast %38 : vector<1x64xf32> to vector<8x64xf32>
    %40 = arith.addf %37, %39 : vector<8x64xf32>
    %cst_27 = arith.constant 0.000000e+00 : f32
    %41 = vector.broadcast %cst_27 : f32 to vector<8x64xf32>
    %42 = arith.maximumf %40, %41 : vector<8x64xf32>
    %c64 = arith.constant 64 : index
    %c0_28 = arith.constant 0 : index
    %43 = vector.load %arg3[%c64, %c0_28] : memref<232x128xf32, #tpu.memory_space<vmem>>, vector<128x64xf32>
    %cst_29 = arith.constant dense<0.000000e+00> : vector<8x128xf32>
    %44 = tpu.matmul %42, %43, %cst_29 {dimension_numbers = #tpu.dot_dimension_numbers<[1], [1], [0], [0], [0, 0, 1, 0], [], []>} : vector<8x64xf32>, vector<128x64xf32>, vector<8x128xf32> -> vector<8x128xf32>
    %c224 = arith.constant 224 : index
    %c0_30 = arith.constant 0 : index
    %45 = vector.load %arg3[%c224, %c0_30] : memref<232x128xf32, #tpu.memory_space<vmem>>, vector<1x128xf32>
    %46 = vector.broadcast %45 : vector<1x128xf32> to vector<8x128xf32>
    %47 = arith.addf %44, %46 : vector<8x128xf32>
    %c0_31 = arith.constant 0 : index
    %c0_32 = arith.constant 0 : index
    %48 = vector.load %arg4[%c0_31, %c0_32] : memref<8x128xf32, #tpu.memory_space<vmem>>, vector<8x128xf32>
    tpu.vector_store %arg4[%c0_31, %c0_32], %47 {strides = array<i32>} : memref<8x128xf32, #tpu.memory_space<vmem>>, vector<8x128xf32>,
    return
  }
  func.func @transform_0(%arg0: i32) -> (i32, i32) {
    %c0_i32 = arith.constant 0 : i32
    %c0_i32_0 = arith.constant 0 : i32
    return %arg0, %c0_i32 : i32, i32
  }
  func.func @transform_1(%arg0: i32) -> (i32, i32) {
    %c0_i32 = arith.constant 0 : i32
    %c0_i32_0 = arith.constant 0 : i32
    %c0_i32_1 = arith.constant 0 : i32
    return %c0_i32, %c0_i32_0 : i32, i32
  }
  func.func @transform_2(%arg0: i32) -> (i32, i32) {
    %c0_i32 = arith.constant 0 : i32
    %c0_i32_0 = arith.constant 0 : i32
    %c0_i32_1 = arith.constant 0 : i32
    return %c0_i32, %c0_i32_0 : i32, i32
  }
  func.func @transform_3(%arg0: i32) -> (i32, i32) {
    %c0_i32 = arith.constant 0 : i32
    %c0_i32_0 = arith.constant 0 : i32
    return %arg0, %c0_i32 : i32, i32
  }
}

</mosaic_0001>

<bundles_post_ra>
// kernel: forward.1
= control target key start
LH: loop header
LB: loop body
LE: loop exit
PB: predicated region body
PF: predicated region fallthrough
CT: control target
= control target key end

     0   :  { %8 = vsyncpa [#allocation3], 0  ;;  %s1345_s12 = smov 0   ;;  %s1548_s0 = inlined_call_operand.vmem [shape: f32[16,256], index: 0, kind: input, shape index: {}]   ;;  %s1549_s1 = inlined_call_operand.vmem [shape: f32[120,256], index: 1, kind: input, shape index: {}]   ;;  %s1550_s2 = inlined_call_operand.hbm [shape: f32[232,128], index: 2, kind: input, shape index: {}]   ;;  %s1551_s3 = inlined_call_operand.vmem [shape: f32[16,128], index: 3, kind: output, shape index: {}]  }
   0x1 LB: > { %s1351_s13 = sadd.s32 4294967295, %s1314_s12   ;;  %p1057_p0 = scmp.ge.s32.totalorder %s1314_s12, 1  ;;  %s1314_s12 = sphi %s1345_s12, %s14_s12  }
   0x2   : > { %p113_p1 = scmp.lt.s32.totalorder %s1314_s12, 3  ;;  %s1316_s14 = smov [#allocation2]  }
   0x3   : > { %s128_s15 = sshll.u32 %s1316_s14, 4  ;;  %p1552_p3 = scmp.eq.s32.totalorder %s1351_s13, 0  ;;  %s129_s15 = int_to_ptr.vmem [resolvable:$true] %s128_s15 }
   0x4   : > { %p1355_p2 = pnand %p1057_p0, %p113_p1  ;;  %s1276_s20 = scalar_lea.hbm %s1550_s2, 3712 }
   0x5   : > { %p1277_p6 = scmp.ne.s32.totalorder %s1550_s2, %s1276_s20  ;;  %p1283_p10 = scmp.lt.u32.totalorder %s1276_s20, %s1550_s2 }
   0x6   : > { %s1554_s16 = scalar_select %p1355_p2, 1, 0 }
   0x7   : > { %p1251_p4 = pneg %p1355_p2 }
   0x9   : > { %p1364_p5 = pnand %p1552_p3, %p1251_p4 }
   0xb   : > { %p1278_p7 = pneg %p1364_p5 }
   0xd   : > { %p1279_p8 = pnand %p1278_p7, %p1277_p6 }
   0xf   : > { %p1280_p9 = pneg %p1279_p8 }
  0x11   : > { %p1285_p11 = pnand %p1283_p10, %p1280_p9 }
  0x13   : > { %1288 = shalt.err (!%p1285_p11)
}
  0x14   : > { %s1289_s25 = scalar_lea.vmem %s129_s15, 3712  ;;  %p1297_p1 = scmp.lt.s32.totalorder %s129_s15, %s129_s15 }
  0x15   : > { %p1290_p12 = scmp.ne.s32.totalorder %s129_s15, %s1289_s25  ;;  %p1298_p4 = scmp.lt.s32.totalorder %s1289_s25, %s1289_s25 }
  0x17   : > { %p1292_p13 = pnand %p1290_p12, %p1278_p7  ;;  %p1299_p3 = por %p1298_p4, %p1297_p1 }
  0x19   : > { %p1293_p0 = pneg %p1292_p13 }
  0x1b   : > { %p1300_p2 = pnand %p1299_p3, %p1293_p0 }
  0x1d   : > { %1303 = shalt.err (!%p1300_p2)
}
  0x1e   : > { %s1317_s26 = smov 128   ;;  %s1318_s27 = smov 8  }
  0x1f   : > { %1254 = dma.hbm_to_vmem [thread:$0]  (!%p1364_p5), %s1550_s2, 3712, %s129_s15, [#allocation3], %s1317_s26, %s1317_s26, %s1318_s27  }
  0x20   : > { %p1556_p6 = scmp.ne.s32.totalorder %s1554_s16, 0 }
  0x21   : > { %p1557_p8 = scmp.eq.s32.totalorder (!%p1556_p6), %s1351_s13, 0 }
  0x22   : > { %152 = sbr.rel (%p1556_p6) target bundleno = 2108 (0x83c), region = 32 }
  0x29   : > { %1309 = dma.done.wait (%p1557_p8), [#allocation3], 3712   ;;  %p1558_p7 = pmov %p1557_p8 }
  0x2a   : > { %p175_p2 = scmp.lt.s32.totalorder %s1351_s13, 1  ;;  %v1319_v0 = vmov 0.0   ;;  %v1320_v1 = vmov 0   ;;  %v187_v4 = vld [vmem:[#allocation2] sm:$0xff]  ;;  %vm193_vm0 = vcmask 64512   ;;  %v1321_v6 = vmov 1  }
  0x2b   : > { %1311 = vsyncadd (%p1558_p7), [#allocation3], 4294963584  ;;  %261 = vmatprep.mubr.f32.mxu1 %v1319_v0  ;;  %1274 = vset.pattern.permute.xlu0 %v1320_v1  ;;  %v186_v5 = vld [vmem:[#allocation2 + $0xc0] sm:$0xff]  ;;  %v351_v13 = vld [vmem:[%s1549_s1 + $0x8] sm:$0xff]  ;;  %vm275_vm1 = vcmask 130048   ;;  %vm1322_vm2 = vmmov 0  }
  0x2c   : > { %s1562_s13 = smov (!%p175_p2, %s1351_s13), 1  ;;  %1137 = vmatprep.subr.mxu0 %v1319_v0  ;;  %190 = vperm.xlu0 %1274, %v186_v5   ;;  %v353_v14 = vld [vmem:[%s1549_s1 + $0x18] sm:$0xff]  ;;  %v270_v19 = vld [vmem:[#allocation2 + $0x10] sm:$0xff]  ;;  %v350_v20 = vld [vmem:[%s1549_s1] sm:$0xff]  ;;  %v1323_v38 = vmov 0.0|0.0   ;;  %s1324_s21 = smov 16  }
  0x2d   : > { %s1094_s30 = sshll.u32 %s1562_s13, 4  ;;  %v1181_v17 = vpack.c.bf16 %v353_v14, %v351_v13  ;;  %v352_v21 = vld [vmem:[%s1549_s1 + $0x10] sm:$0xff]  ;;  %1139 = vmatprep.mubr.msk.f32.mxu0 %vm1322_vm2, %v1319_v0  ;;  %v1067_v28 = vld [vmem:[#allocation2 + $0xc8] ss:$0 sm:$0xff]  ;;  %v515_v35 = vld [vmem:[#allocation2 + $0x18] sm:$0xff]  ;;  %vm519_vm3 = vcmask 261120  }
  0x2e   : > { %s179_s6 = scalar_lea.vmem %s1548_s0, %s1094_s30  ;;  %v1183_v22 = vpack.c.bf16 %v352_v21, %v350_v20  ;;  %v1068_v30 = vld [vmem:[#allocation2 + $0xd0] ss:$0 sm:$0xff]  ;;  %v436_v34 = vld [vmem:[#allocation2 + $0x8] sm:$0xff]  ;;  %v516_v36 = vld [vmem:[#allocation2 + $0x20] sm:$0xff]  ;;  %vm867_vm4 = vcmask 523264   ;;  %s1064_s20 = sshll.u32 %s1562_s13, 3 }
  0x2f   : > { %v185_v2 = vld [vmem:[%s179_s6 + $0x8] sm:$0xff]  ;;  %v184_v3 = vld [vmem:[%s179_s6] sm:$0xff]  ;;  %v1186_v39 = vpack.c.bf16 %v516_v36, %v515_v35  ;;  %v518_v40 = vld [vmem:[#allocation2 + $0x30] sm:$0xff]  ;;  %s183_s23 = scalar_lea.vmem %s1551_s3, %s1064_s20 }
  0x30   : > { %197 = vmatprep.subr.mxu1 %v185_v2  ;;  %1275 = vset.pattern.permute.xlu0 %v1321_v6  ;;  %v517_v37 = vld [vmem:[#allocation2 + $0x28] sm:$0xff]  ;;  %v597_v43 = vld [vmem:[%s1549_s1 + $0x38] sm:$0xff]  ;;  %v594_v47 = vld [vmem:[%s1549_s1 + $0x20] sm:$0xff] }
  0x31   : > { %198 = vmatpush1.msra.mxu1 %v184_v3  ;;  %272 = vperm.xlu0 %1275, %v186_v5   ;;  %v1189_v41 = vpack.c.bf16 %v518_v40, %v517_v37  ;;  %v595_v42 = vld [vmem:[%s1549_s1 + $0x28] sm:$0xff]  ;;  %v596_v48 = vld [vmem:[%s1549_s1 + $0x30] sm:$0xff]  ;;  %v601_v50 = vld [vmem:[%s1549_s1 + $0x58] sm:$0xff] }
  0x32   : > { %1065 = vmatmul.mubr.msk.f32.vlgmr.msra.gmra.mrb[0].mxu1 %vm193_vm0, %v187_v4  ;;  %v1191_v44 = vpack.c.bf16 %v597_v43, %v595_v42  ;;  %v599_v49 = vld [vmem:[%s1549_s1 + $0x48] sm:$0xff]  ;;  %v1193_v51 = vpack.c.bf16 %v596_v48, %v594_v47  ;;  %v598_v55 = vld [vmem:[%s1549_s1 + $0x40] sm:$0xff]  ;;  %v600_v56 = vld [vmem:[%s1549_s1 + $0x50] sm:$0xff] }
  0x33   : > { %343 = vmatprep.mubr.f32.mxu1 %v1319_v0  ;;  %v1195_v53 = vpack.c.bf16 %v601_v50, %v599_v49  ;;  %v1197_v57 = vpack.c.bf16 %v600_v56, %v598_v55  ;;  %v681_v58 = vld [vmem:[%s1549_s1 + $0x78] sm:$0xff]  ;;  %v683_v59 = vld [vmem:[%s1549_s1 + $0x88] sm:$0xff]  ;;  %v680_v61 = vld [vmem:[%s1549_s1 + $0x70] sm:$0xff] }
  0x34   : > { %v1199_v60 = vpack.c.bf16 %v683_v59, %v681_v58  ;;  %v682_v62 = vld [vmem:[%s1549_s1 + $0x80] sm:$0xff]  ;;  %v685_v63 = vld [vmem:[%s1549_s1 + $0x98] sm:$0xff]  ;;  %v687_v1 = vld [vmem:[%s1549_s1 + $0xa8] sm:$0xff] }
  0x35   : > { %v1203_v6 = vpack.c.bf16 %v687_v1, %v685_v63  ;;  %v688_v13 = vld [vmem:[%s1549_s1 + $0xb0] sm:$0xff]  ;;  %v690_v14 = vld [vmem:[%s1549_s1 + $0xc0] sm:$0xff]  ;;  %vm1513_vm5 = vmpackc.low %vm867_vm4, %vm867_vm4 }
  0x36   : > { %v694_v20 = vld [vmem:[%s1549_s1 + $0xe0] sm:$0xff]  ;;  %v848_v35 = vld [vmem:[#allocation2 + $0x50] sm:$0xff]  ;;  %v849_v36 = vld [vmem:[#allocation2 + $0x58] sm:$0xff] }
  0x37   : > { %v1220_v37 = vpack.c.bf16 %v849_v36, %v848_v35  ;;  %v853_v42 = vld [vmem:[#allocation2 + $0x78] sm:$0xff]  ;;  %v856_v47 = vld [vmem:[#allocation2 + $0x90] sm:$0xff]  ;;  %v858_v50 = vld [vmem:[#allocation2 + $0xa0] sm:$0xff] }
  0x38   : > { %v857_v48 = vld [vmem:[#allocation2 + $0x98] sm:$0xff] }
  0x39   : > { %v1236_v49 = vpack.c.bf16 %v857_v48, %v856_v47  ;;  %v1072_v56 = vld [vmem:[#allocation2 + $0xd8] ss:$0 sm:$0xff] }
  0xab   : > { %v191_v7 = vpop.permute.xlu0 %190 }
  0xb0   : > { %v273_v23 = vpop.permute.xlu0 %272 }
 0x105   : > { %v263_v8 = vpop.f32.mrb[0].mxu1 }
 0x106   : > { %v264_v9 = vadd.f32 %v263_v8, %v191_v7  ;;  %v265_v10 = vpop.f32.mrb[1].mxu1  ;;  %v686_v8 = vld [vmem:[%s1549_s1 + $0xa0] sm:$0xff] }
 0x107   : > { %v266_v11 = vadd.f32 %v265_v10, %v191_v7  ;;  %v684_v7 = vld [vmem:[%s1549_s1 + $0x90] sm:$0xff]  ;;  %v691_v10 = vld [vmem:[%s1549_s1 + $0xc8] sm:$0xff] }
 0x108   : > { %v268_v12 = vmax.f32 %v264_v9, 0.0  ;;  %v689_v9 = vld [vmem:[%s1549_s1 + $0xb8] sm:$0xff] }
 0x109   : > { %v269_v15 = vmax.f32 %v266_v11, 0.0  ;;  %v1205_v11 = vpack.c.bf16 %v686_v8, %v684_v7 }
 0x10a   : > { %v1179_v18 = vpack.c.bf16 %v268_v12, %v184_v3  ;;  %v1201_v3 = vpack.c.bf16 %v682_v62, %v680_v61  ;;  %v1207_v12 = vpack.c.bf16 %v691_v10, %v689_v9  ;;  %v1074_v61 = vld [vmem:[#allocation2 + $0xe0] ss:$0 sm:$0xff] }
 0x10b   : > { %v1177_v16 = vpack.c.bf16 %v269_v15, %v185_v2  ;;  %v693_v15 = vld [vmem:[%s1549_s1 + $0xd8] sm:$0xff] }
 0x10d   : > { %1178 = vmatprep.subr.bf16.mxu1 %v1177_v16  ;;  %v695_v16 = vld [vmem:[%s1549_s1 + $0xe8] sm:$0xff] }
 0x10e   : > { %1180 = vmatpush1.bf16.msra.mxu1 %v1179_v18  ;;  %v1211_v18 = vpack.c.bf16 %v695_v16, %v693_v15 }
 0x10f   : > { %1182 = vmatprep.subr.bf16.mxu1 %v1181_v17  ;;  %v1209_v17 = vpack.c.bf16 %v690_v14, %v688_v13 }
 0x111   : > { %1066 = vmatmul.mubr.msk.f32.vlgmr.msra.gmra.mrb[2].mxu1 %vm275_vm1, %v270_v19  ;;  %v692_v19 = vld [vmem:[%s1549_s1 + $0xd0] sm:$0xff] }
 0x112   : > { %v1213_v21 = vpack.c.bf16 %v694_v20, %v692_v19 }
 0x117   : > { %1184 = vmatpush1.bf16.xpose.msra.mxu1 %v1183_v22  ;;  %v677_v22 = vld [vmem:[%s1549_s1 + $0x68] sm:$0xff] }
 0x118   : > { %1121 = vmatprep.subr.mxu1 %v1319_v0 }
 0x1e4   : > { %v345_v24 = vpop.f32.mrb[2].mxu1 }
 0x1e5   : > { %v347_v25 = vpop.f32.mrb[3].mxu1  ;;  %v346_v27 = vadd.f32 %v345_v24, %v273_v23  ;;  %v676_v24 = vld [vmem:[%s1549_s1 + $0x60] sm:$0xff] }
 0x1e6   : > { %v348_v26 = vadd.f32 %v347_v25, %v273_v23 }
 0x1e8   : > { %418 = vmatprep.mubr.f32.mxu1 %v348_v26 }
 0x1e9   : > { %419 = vmatmul.mubr.f32.vlgmr.msra.gmra.mrb[4].mxu1 %v346_v27 }
 0x1ea   : > { %1123 = vmatprep.mubr.msk.f32.mxu1 %vm1322_vm2, %v1319_v0 }
 0x2bc   : > { %v420_v29 = vpop.f32.mrb[4].mxu1 }
 0x2bd   : > { %v429_v31 = vmul.f32 %v1067_v28, %v420_v29  ;;  %v422_v32 = vpop.f32.mrb[5].mxu1  ;;  %v766_v28 = vld [vmem:[#allocation2 + $0x38] sm:$0xff] }
 0x2be   : > { %v847_v32 = vld [vmem:[#allocation2 + $0x48] sm:$0xff] }
 0x2bf   : > { %v435_v33 = vadd.f32 %v1068_v30, %v429_v31  ;;  %v846_v31 = vld [vmem:[#allocation2 + $0x40] sm:$0xff] }
 0x2c1   : > { %1122 = vmatpush3.msra.mxu1 %v435_v33 }
 0x2c2   : > { %1124 = vmatmul.mubr.msk.f32.vlgmr.msra.gmra.mrb[6].mxu1 %vm193_vm0, %v436_v34  ;;  %1185 = vmatprep.subr.bf16.mxu1 %v1323_v38 }
 0x2c3   : > { %1134 = vmatprep.mubr.msk.f32.mxu1 %vm1322_vm2, %v1319_v0  ;;  %1187 = vmatpush3.bf16.msra.mxu1 %v1186_v39  ;;  %v851_v39 = vld [vmem:[#allocation2 + $0x68] sm:$0xff] }
 0x2c4   : > { %1188 = vmatprep.subr.bf16.mxu1 %v1323_v38 }
 0x2c7   : > { %1190 = vmatpush3.bf16.msra.mxu1 %v1189_v41  ;;  %v852_v41 = vld [vmem:[#allocation2 + $0x70] sm:$0xff] }
 0x2c8   : > { %1192 = vmatprep.subr.bf16.mxu1 %v1191_v44  ;;  %v1228_v43 = vpack.c.bf16 %v853_v42, %v852_v41  ;;  %v854_v44 = vld [vmem:[#allocation2 + $0x80] sm:$0xff] }
 0x395   : > { %v506_v45 = vpop.f32.mrb[6].mxu1 }
 0x396   : > { %511 = vrot.lane.b32.xlu1 %v506_v45, %s1324_s21  ;;  %v1125_v46 = vpop.f32.mrb[7].mxu1  ;;  %v855_v45 = vld [vmem:[#allocation2 + $0x88] sm:$0xff] }
 0x397   : > { %v1232_v46 = vpack.c.bf16 %v855_v45, %v854_v44 }
 0x408   : > { %v512_v52 = vpop.permute.xlu1 %511 }
 0x409   : > { %v514_v54 = vsel %vm275_vm1, %v435_v33, %v512_v52  ;;  %v1216_v33 = vpack.c.bf16 %v847_v32, %v846_v31 }
 0x40a   : > { %1135 = vmatmul.mubr.msk.f32.vlgmr.msra.gmra.mrb[8].mxu1 %vm519_vm3, %v514_v54  ;;  %v861_v54 = vld [vmem:[#allocation2 + $0xb8] sm:$0xff] }
 0x40b   : > { %1194 = vmatpush1.bf16.msra.mxu1 %v1193_v51  ;;  %669 = vmatprep.mubr.f32.mxu1 %v1319_v0  ;;  %v859_v51 = vld [vmem:[#allocation2 + $0xa8] sm:$0xff] }
 0x40c   : > { %1196 = vmatprep.subr.bf16.mxu1 %v1195_v53  ;;  %v1240_v52 = vpack.c.bf16 %v859_v51, %v858_v50  ;;  %v860_v53 = vld [vmem:[#allocation2 + $0xb0] sm:$0xff] }
 0x40d   : > { %v1244_v55 = vpack.c.bf16 %v861_v54, %v860_v53 }
 0x40f   : > { %1198 = vmatpush1.bf16.msra.mxu1 %v1197_v57 }
 0x410   : > { %1200 = vmatprep.subr.bf16.mxu1 %v1199_v60 }
 0x4dd   : > { %v589_v2 = vpop.f32.mrb[8].mxu1 }
 0x4de   : > { %v593_v4 = vmax.f32 %v589_v2, 0.0  ;;  %v1136_v5 = vpop.f32.mrb[9].mxu1 }
 0x4e0   : > { %1071 = vmatmul.mubr.msk.f32.vlgmr.msra.gmra.mrb[10].mxu1 %vm519_vm3, %v593_v4 }
 0x4e1   : > { %1202 = vmatpush1.bf16.xpose.msra.mxu1 %v1201_v3 }
 0x4e2   : > { %1204 = vmatprep.subr.bf16.mxu1 %v1203_v6 }
 0x4e9   : > { %1206 = vmatpush1.bf16.xpose.msra.mxu1 %v1205_v11 }
 0x4ea   : > { %1208 = vmatprep.subr.bf16.mxu1 %v1207_v12 }
 0x4f1   : > { %1210 = vmatpush1.bf16.xpose.msra.mxu1 %v1209_v17 }
 0x4f2   : > { %1212 = vmatprep.subr.bf16.mxu1 %v1211_v18 }
 0x4f9   : > { %1214 = vmatpush1.bf16.xpose.msra.mxu1 %v1213_v21 }
 0x5b3   : > { %v671_v23 = vpop.f32.mrb[10].mxu1 }
 0x5b4   : > { %v673_v25 = vpop.f32.mrb[11].mxu1  ;;  %v678_v27 = vmul.f32 %v676_v24, %v671_v23 }
 0x5b5   : > { %v679_v26 = vmul.f32 %v677_v22, %v673_v25 }
 0x5b7   : > { %760 = vmatprep.mubr.f32.mxu1 %v679_v26 }
 0x5b8   : > { %761 = vmatmul.mubr.f32.vlgmr.msra.gmra.mrb[12].mxu1 %v678_v27 }
 0x68b   : > { %v762_v29 = vpop.f32.mrb[12].mxu1 }
 0x68c   : > { %v764_v30 = vpop.f32.mrb[13].mxu1  ;;  %1138 = vmatpush3.msra.mxu0 %v762_v29 }
 0x68d   : > { %1140 = vmatmul.mubr.msk.f32.vlgmr.msra.gmra.mrb[0].mxu0 %vm193_vm0, %v766_v28  ;;  %1215 = vmatprep.subr.bf16.mxu0 %v1323_v38 }
 0x68e   : > { %1174 = vmatprep.mubr.msk.f32.mxu0 %vm1322_vm2, %v1319_v0  ;;  %v850_v0 = vld [vmem:[#allocation2 + $0x60] sm:$0xff] }
 0x68f   : > { %v1224_v40 = vpack.c.bf16 %v851_v39, %v850_v0 }
 0x693   : > { %1218 = vmatpush3.bf16.xpose.msk.msra.mxu0 %vm1513_vm5, %v1216_v33 }
 0x694   : > { %1219 = vmatprep.subr.bf16.mxu0 %v1323_v38 }
 0x69b   : > { %1222 = vmatpush3.bf16.xpose.msk.msra.mxu0 %vm1513_vm5, %v1220_v37 }
 0x69c   : > { %1223 = vmatprep.subr.bf16.mxu0 %v1323_v38 }
 0x6a3   : > { %1226 = vmatpush3.bf16.xpose.msk.msra.mxu0 %vm1513_vm5, %v1224_v40 }
 0x6a4   : > { %1227 = vmatprep.subr.bf16.mxu0 %v1323_v38 }
 0x6ab   : > { %1230 = vmatpush3.bf16.xpose.msk.msra.mxu0 %vm1513_vm5, %v1228_v43 }
 0x6ac   : > { %1231 = vmatprep.subr.bf16.mxu0 %v1323_v38 }
 0x6b3   : > { %1234 = vmatpush3.bf16.xpose.msk.msra.mxu0 %vm1513_vm5, %v1232_v46 }
 0x6b4   : > { %1235 = vmatprep.subr.bf16.mxu0 %v1323_v38 }
 0x6bb   : > { %1238 = vmatpush3.bf16.xpose.msk.msra.mxu0 %vm1513_vm5, %v1236_v49 }
 0x6bc   : > { %1239 = vmatprep.subr.bf16.mxu0 %v1323_v38 }
 0x6c3   : > { %1242 = vmatpush3.bf16.xpose.msk.msra.mxu0 %vm1513_vm5, %v1240_v52 }
 0x6c4   : > { %1243 = vmatprep.subr.bf16.mxu0 %v1323_v38 }
 0x6cb   : > { %1246 = vmatpush3.bf16.xpose.msk.msra.mxu0 %vm1513_vm5, %v1244_v55 }
 0x760   : > { %v841_v57 = vpop.f32.mrb[0].mxu0 }
 0x761   : > { %v842_v58 = vadd.f32 %v1072_v56, %v841_v57  ;;  %v1141_v59 = vpop.f32.mrb[1].mxu0 }
 0x763   : > { %v845_v60 = vmax.f32 %v842_v58, 0.0 }
 0x765   : > { %1175 = vmatmul.mubr.msk.f32.vlgmr.msra.gmra.mrb[2].mxu0 %vm867_vm4, %v845_v60 }
 0x838   : > { %v985_v38 = vpop.f32.mrb[2].mxu0 }
 0x839   : > { %v986_v62 = vadd.f32 %v1074_v61, %v985_v38  ;;  %v1176_v63 = vpop.f32.mrb[3].mxu0 }
 0x83b   : > { %989 = vst [vmem:[%s183_s23] sm:$0xff] %v986_v62 }
 0x83c PF: > { %s14_s12 = sadd.s32 1, %s1314_s12  }
 0x83d   : > { %p11_p3 = scmp.ge.s32.totalorder %s14_s12, 4  }
 0x83f   :  { %13 = sbr.rel (!%p11_p3) target bundleno = 1 (0x1), region = 67 }
 0x846   :  { %1009 = vsyncpa [#allocation3], 1 }
 0x847   :  { %1011 = vsyncpa [#allocation3 + $0x1], 1 }

</bundles_post_ra>
